<compile_context>
chip_gen: v7x
topology: tpu7x:2x2x1
jax: 0.10.0
libtpu: 0.0.40
codegen_flags: <defaults>
</compile_context>

<pallas_src>
import jax
import jax.numpy as jnp
from jax.experimental import pallas as pl
from jax.experimental.pallas import tpu as pltpu


LANE = 128          # lane width (last dim of a vreg)
SUBLANE_BF16 = 16   # bf16 packs 16 sublanes per vreg


def _round_up(x, m):
    return (x + m - 1) // m * m


def _cdiv(a, b):
    return (a + b - 1) // b


def ensemble_mlp_kernel(x_ref,
                        w1_ref, w2_ref, w3_ref, w4_ref, w5_ref,
                        b_ref, out_ref):
    """One (ensemble member e, batch tile n) grid step: 5 x EnsembleFC (+swish)."""
    b = b_ref[0]                        # (8, Lmax) f32 — packed biases, one row/layer
    h = x_ref[0].astype(jnp.bfloat16)   # cast in-kernel; x is not pre-padded/cast in HBM

    def fc(h_in, w_ref, row, swish):
        # EnsembleFC forward: bmm(input, weight) + bias  (one ensemble member)
        z = jnp.dot(h_in, w_ref[0], preferred_element_type=jnp.float32)
        z = z + b[row, :z.shape[-1]][None, :]
        if swish:
            # swish(z) = z*sigmoid(z) = z*0.5*(1+tanh(z/2)): one EUP push per
            # element instead of exp + reciprocal; kept in f32 (v5e-safe).
            z = z * (0.5 * (1.0 + jnp.tanh(0.5 * z)))
            return z.astype(jnp.bfloat16)   # next MXU operand in bf16
        return z

    h = fc(h, w1_ref, 0, True)
    h = fc(h, w2_ref, 1, True)
    h = fc(h, w3_ref, 2, True)
    h = fc(h, w4_ref, 3, True)
    z = fc(h, w5_ref, 4, False)
    out_ref[0] = z.astype(out_ref.dtype)    # (TM, Dout) store, Dout == real out dim


def prepare_params(params):
    """One-time parameter prep (call when params are created/updated, NOT per
    forward): pad/cast weights to bf16 MXU layout and pack biases into a
    single lane-dense slab.  Layer-1 K dim and layer-5 N dim stay unpadded
    (full-dim blocks are legal), so no padded x copy and no padded output
    slab are needed."""
    E, Din, H = params["w1"].shape
    Dout = params["w5"].shape[-1]
    H_p = _round_up(H, LANE)
    Lmax = max(H_p, _round_up(Dout, LANE))

    def pad_w(w, kp, lp):
        buf = jnp.zeros((E, kp, lp), jnp.bfloat16)
        return buf.at[:, :w.shape[1], :w.shape[2]].set(w.astype(jnp.bfloat16))

    prepped = {
        "w1": pad_w(params["w1"], Din, H_p),
        "w2": pad_w(params["w2"], H_p, H_p),
        "w3": pad_w(params["w3"], H_p, H_p),
        "w4": pad_w(params["w4"], H_p, H_p),
        "w5": pad_w(params["w5"], H_p, Dout),
    }

    # All five biases in one (E, 8, Lmax) lane-dense slab: a single DMA per
    # ensemble member, 8-aligned sublane dim.  Biases stay f32 (added after
    # the f32 accumulation).
    b_packed = jnp.zeros((E, 8, Lmax), jnp.float32)
    for i in range(1, 5):
        b_packed = b_packed.at[:, i - 1, :H].set(params[f"b{i}"])
    b_packed = b_packed.at[:, 4, :Dout].set(params["b5"])
    prepped["b_packed"] = b_packed
    return prepped


def ensemble_model_forward(x, prepped, *, tm_max=1024):
    """x: (E, N, Din) float32.  prepped: output of prepare_params()."""
    E, N, Din = x.shape
    H_p = prepped["w1"].shape[-1]
    Dout = prepped["w5"].shape[-1]
    Lmax = prepped["b_packed"].shape[-1]

    # Balanced batch tile (multiple of 16 for bf16 sublane packing): choose TM
    # so the last tile is nearly full instead of a mostly-empty remainder.
    n_tiles = max(1, _cdiv(N, tm_max))
    TM = _round_up(_cdiv(N, n_tiles), SUBLANE_BF16)
    n_tiles = _cdiv(N, TM)
    N_p = n_tiles * TM

    # Only a (small, by construction) zero-pad along the batch axis; padded
    # rows get bias+swish garbage but are row-local and stripped at the end.
    if N_p != N:
        x_in = jnp.zeros((E, N_p, Din), x.dtype).at[:, :N, :].set(x)
    else:
        x_in = x

    def w_spec(kp, lp):
        # depends only on e -> block stays resident across consecutive n steps
        return pl.BlockSpec((1, kp, lp), lambda e, n: (e, 0, 0))

    grid_spec = pltpu.PrefetchScalarGridSpec(
        num_scalar_prefetch=0,
        grid=(E, n_tiles),                      # batch-tile axis innermost
        in_specs=[
            pl.BlockSpec((1, TM, Din), lambda e, n: (e, n, 0)),   # x tile (unpadded lanes)
            w_spec(Din, H_p),                                     # nn1
            w_spec(H_p, H_p),                                     # nn2
            w_spec(H_p, H_p),                                     # nn3
            w_spec(H_p, H_p),                                     # nn4
            w_spec(H_p, Dout),                                    # nn5 (unpadded N)
            pl.BlockSpec((1, 8, Lmax), lambda e, n: (e, 0, 0)),   # packed biases
        ],
        out_specs=pl.BlockSpec((1, TM, Dout), lambda e, n: (e, n, 0)),
    )

    out = pl.pallas_call(
        ensemble_mlp_kernel,
        out_shape=jax.ShapeDtypeStruct((E, N_p, Dout), jnp.float32),
        grid_spec=grid_spec,
        compiler_params=pltpu.CompilerParams(
            # No cross-step accumulation -> both axes parallel (v7x splits the
            # grid across its 2 TensorCores; no-op on v5e/v6e).
            dimension_semantics=("parallel", "parallel"),
            # Working set at TM~1024, H_p<=256 is a few MiB double-buffered;
            # 48 MiB leaves headroom under v7x's 64 MiB physical VMEM.
            vmem_limit_bytes=48 * 1024 * 1024,
        ),
    )(x_in, prepped["w1"], prepped["w2"], prepped["w3"], prepped["w4"],
      prepped["w5"], prepped["b_packed"])

    # Strip batch padding only (no lane padding on the output).
    if N_p != N:
        out = out[:, :N, :]
    return out


def init_ensemble_params(key, state_size, action_size, reward_size,
                         ensemble_size, hidden_size):
    """Truncated-normal init (std = 1/(2*sqrt(in)), bias = 0), mirroring
    init_weights() in the PyTorch module.  Params kept unpadded in f32."""
    in_dim = state_size + action_size
    out_dim = state_size + reward_size
    layer_dims = [(in_dim, hidden_size),
                  (hidden_size, hidden_size),
                  (hidden_size, hidden_size),
                  (hidden_size, hidden_size),
                  (hidden_size, out_dim)]
    params = {}
    keys = jax.random.split(key, len(layer_dims))
    for i, ((d_in, d_out), k) in enumerate(zip(layer_dims, keys), start=1):
        std = 1.0 / (2.0 * jnp.sqrt(jnp.float32(d_in)))
        w = std * jax.random.truncated_normal(
            k, -2.0, 2.0, (ensemble_size, d_in, d_out), dtype=jnp.float32)
        b = jnp.zeros((ensemble_size, d_out), dtype=jnp.float32)
        params[f"w{i}"] = w
        params[f"b{i}"] = b
    return params


def reference_forward(x, params):
    """Plain-JAX f32 reference of the stacked EnsembleFC forward
    (dropout = identity)."""
    h = x
    for i in range(1, 5):
        h = h @ params[f"w{i}"] + params[f"b{i}"][:, None, :]
        h = h * jax.nn.sigmoid(h)
    return h @ params["w5"] + params["b5"][:, None, :]


if __name__ == "__main__":
    # Small shapes consistent with the module.
    state_size, action_size, reward_size = 5, 3, 1
    ensemble_size = 4
    hidden_size = 32
    N = 8  # batch per ensemble member

    key = jax.random.PRNGKey(0)
    kx, kp = jax.random.split(key)
    x = jax.random.normal(
        kx, (ensemble_size, N, state_size + action_size), dtype=jnp.float32)
    params = init_ensemble_params(
        kp, state_size, action_size, reward_size, ensemble_size, hidden_size)

    # One-time param preparation (padding / bf16 cast / bias packing) —
    # intentionally outside the jitted per-step forward.
    prepped = prepare_params(params)
    prepped = jax.block_until_ready(prepped)

    fwd = jax.jit(ensemble_model_forward)
    out = jax.block_until_ready(fwd(x, prepped))

    ref = reference_forward(x, params)
    assert out.shape == (ensemble_size, N, state_size + reward_size)
    max_err = float(jnp.max(jnp.abs(out - ref)))
    # bf16 MXU operands with f32 accumulation: expected deviation ~1e-3.
    assert jnp.allclose(out, ref, atol=2e-2, rtol=2e-2), (
        f"mismatch vs reference, max abs err={max_err}")

    print("KERNEL_OK")
</pallas_src>

<mosaic_0001>
module attributes {stable_mosaic.version = 11 : i64} {
  func.func @ensemble_mlp_kernel(%arg0: i32, %arg1: i32, %arg2: memref<1x16x8xf32, #tpu.memory_space<vmem>>, %arg3: memref<1x8x128xbf16, #tpu.memory_space<vmem>>, %arg4: memref<1x128x128xbf16, #tpu.memory_space<vmem>>, %arg5: memref<1x128x128xbf16, #tpu.memory_space<vmem>>, %arg6: memref<1x128x128xbf16, #tpu.memory_space<vmem>>, %arg7: memref<1x128x6xbf16, #tpu.memory_space<vmem>>, %arg8: memref<1x8x128xf32, #tpu.memory_space<vmem>>, %arg9: memref<1x16x6xf32, #tpu.memory_space<vmem>>) attributes {dimension_semantics = [#tpu.dimension_semantics<parallel>, #tpu.dimension_semantics<parallel>], iteration_bounds = array<i64: 4, 1>, scalar_prefetch = 0 : i64, scratch_operands = 0 : i64, tpu.core_type = #tpu.core_type<tc>, window_params = [{transform_indices = @transform_0, window_bounds = array<i64: 1, 16, 8>}, {transform_indices = @transform_1, window_bounds = array<i64: 1, 8, 128>}, {transform_indices = @transform_2, window_bounds = array<i64: 1, 128, 128>}, {transform_indices = @transform_3, window_bounds = array<i64: 1, 128, 128>}, {transform_indices = @transform_4, window_bounds = array<i64: 1, 128, 128>}, {transform_indices = @transform_5, window_bounds = array<i64: 1, 128, 6>}, {transform_indices = @transform_6, window_bounds = array<i64: 1, 8, 128>}, {transform_indices = @transform_7, window_bounds = array<i64: 1, 16, 6>}]} {
    %c0 = arith.constant 0 : index
    %c0_0 = arith.constant 0 : index
    %c0_1 = arith.constant 0 : index
    %0 = vector.load %arg8[%c0, %c0_0, %c0_1] : memref<1x8x128xf32, #tpu.memory_space<vmem>>, vector<1x8x128xf32>
    %1 = vector.shape_cast %0 : vector<1x8x128xf32> to vector<8x128xf32>
    %c0_2 = arith.constant 0 : index
    %c0_3 = arith.constant 0 : index
    %c0_4 = arith.constant 0 : index
    %2 = vector.load %arg2[%c0_2, %c0_3, %c0_4] : memref<1x16x8xf32, #tpu.memory_space<vmem>>, vector<1x16x8xf32>
    %3 = vector.shape_cast %2 : vector<1x16x8xf32> to vector<16x8xf32>
    %4 = arith.truncf %3 : vector<16x8xf32> to vector<16x8xbf16>
    %c0_5 = arith.constant 0 : index
    %c0_6 = arith.constant 0 : index
    %c0_7 = arith.constant 0 : index
    %5 = vector.load %arg3[%c0_5, %c0_6, %c0_7] : memref<1x8x128xbf16, #tpu.memory_space<vmem>>, vector<1x8x128xbf16>
    %6 = vector.shape_cast %5 : vector<1x8x128xbf16> to vector<8x128xbf16>
    %cst = arith.constant dense<0.000000e+00> : vector<16x128xf32>
    %7 = tpu.matmul %4, %6, %cst {dimension_numbers = #tpu.dot_dimension_numbers<[1], [0], [0], [1], [0, 0, 1, 1], [], []>} : vector<16x8xbf16>, vector<8x128xbf16>, vector<16x128xf32> -> vector<16x128xf32>
    %8 = vector.extract_strided_slice %1 {offsets = [0, 0], sizes = [1, 128], strides = [1, 1]} : vector<8x128xf32> to vector<1x128xf32>
    %9 = vector.shape_cast %8 : vector<1x128xf32> to vector<128xf32>
    %10 = vector.shape_cast %9 : vector<128xf32> to vector<1x128xf32>
    %11 = vector.broadcast %10 : vector<1x128xf32> to vector<16x128xf32>
    %12 = arith.addf %7, %11 : vector<16x128xf32>
    %cst_8 = arith.constant 5.000000e-01 : f32
    %13 = vector.broadcast %cst_8 : f32 to vector<16x128xf32>
    %14 = arith.mulf %13, %12 : vector<16x128xf32>
    %15 = math.tanh %14 : vector<16x128xf32>
    %cst_9 = arith.constant 1.000000e+00 : f32
    %16 = vector.broadcast %cst_9 : f32 to vector<16x128xf32>
    %17 = arith.addf %16, %15 : vector<16x128xf32>
    %cst_10 = arith.constant 5.000000e-01 : f32
    %18 = vector.broadcast %cst_10 : f32 to vector<16x128xf32>
    %19 = arith.mulf %18, %17 : vector<16x128xf32>
    %20 = arith.mulf %12, %19 : vector<16x128xf32>
    %21 = arith.truncf %20 : vector<16x128xf32> to vector<16x128xbf16>
    %c0_11 = arith.constant 0 : index
    %c0_12 = arith.constant 0 : index
    %c0_13 = arith.constant 0 : index
    %22 = vector.load %arg4[%c0_11, %c0_12, %c0_13] : memref<1x128x128xbf16, #tpu.memory_space<vmem>>, vector<1x128x128xbf16>
    %23 = vector.shape_cast %22 : vector<1x128x128xbf16> to vector<128x128xbf16>
    %cst_14 = arith.constant dense<0.000000e+00> : vector<16x128xf32>
    %24 = tpu.matmul %21, %23, %cst_14 {dimension_numbers = #tpu.dot_dimension_numbers<[1], [0], [0], [1], [0, 0, 1, 1], [], []>} : vector<16x128xbf16>, vector<128x128xbf16>, vector<16x128xf32> -> vector<16x128xf32>
    %25 = vector.extract_strided_slice %1 {offsets = [1, 0], sizes = [1, 128], strides = [1, 1]} : vector<8x128xf32> to vector<1x128xf32>
    %26 = vector.shape_cast %25 : vector<1x128xf32> to vector<128xf32>
    %27 = vector.shape_cast %26 : vector<128xf32> to vector<1x128xf32>
    %28 = vector.broadcast %27 : vector<1x128xf32> to vector<16x128xf32>
    %29 = arith.addf %24, %28 : vector<16x128xf32>
    %cst_15 = arith.constant 5.000000e-01 : f32
    %30 = vector.broadcast %cst_15 : f32 to vector<16x128xf32>
    %31 = arith.mulf %30, %29 : vector<16x128xf32>
    %32 = math.tanh %31 : vector<16x128xf32>
    %cst_16 = arith.constant 1.000000e+00 : f32
    %33 = vector.broadcast %cst_16 : f32 to vector<16x128xf32>
    %34 = arith.addf %33, %32 : vector<16x128xf32>
    %cst_17 = arith.constant 5.000000e-01 : f32
    %35 = vector.broadcast %cst_17 : f32 to vector<16x128xf32>
    %36 = arith.mulf %35, %34 : vector<16x128xf32>
    %37 = arith.mulf %29, %36 : vector<16x128xf32>
    %38 = arith.truncf %37 : vector<16x128xf32> to vector<16x128xbf16>
    %c0_18 = arith.constant 0 : index
    %c0_19 = arith.constant 0 : index
    %c0_20 = arith.constant 0 : index
    %39 = vector.load %arg5[%c0_18, %c0_19, %c0_20] : memref<1x128x128xbf16, #tpu.memory_space<vmem>>, vector<1x128x128xbf16>
    %40 = vector.shape_cast %39 : vector<1x128x128xbf16> to vector<128x128xbf16>
    %cst_21 = arith.constant dense<0.000000e+00> : vector<16x128xf32>
    %41 = tpu.matmul %38, %40, %cst_21 {dimension_numbers = #tpu.dot_dimension_numbers<[1], [0], [0], [1], [0, 0, 1, 1], [], []>} : vector<16x128xbf16>, vector<128x128xbf16>, vector<16x128xf32> -> vector<16x128xf32>
    %42 = vector.extract_strided_slice %1 {offsets = [2, 0], sizes = [1, 128], strides = [1, 1]} : vector<8x128xf32> to vector<1x128xf32>
    %43 = vector.shape_cast %42 : vector<1x128xf32> to vector<128xf32>
    %44 = vector.shape_cast %43 : vector<128xf32> to vector<1x128xf32>
    %45 = vector.broadcast %44 : vector<1x128xf32> to vector<16x128xf32>
    %46 = arith.addf %41, %45 : vector<16x128xf32>
    %cst_22 = arith.constant 5.000000e-01 : f32
    %47 = vector.broadcast %cst_22 : f32 to vector<16x128xf32>
    %48 = arith.mulf %47, %46 : vector<16x128xf32>
    %49 = math.tanh %48 : vector<16x128xf32>
    %cst_23 = arith.constant 1.000000e+00 : f32
    %50 = vector.broadcast %cst_23 : f32 to vector<16x128xf32>
    %51 = arith.addf %50, %49 : vector<16x128xf32>
    %cst_24 = arith.constant 5.000000e-01 : f32
    %52 = vector.broadcast %cst_24 : f32 to vector<16x128xf32>
    %53 = arith.mulf %52, %51 : vector<16x128xf32>
    %54 = arith.mulf %46, %53 : vector<16x128xf32>
    %55 = arith.truncf %54 : vector<16x128xf32> to vector<16x128xbf16>
    %c0_25 = arith.constant 0 : index
    %c0_26 = arith.constant 0 : index
    %c0_27 = arith.constant 0 : index
    %56 = vector.load %arg6[%c0_25, %c0_26, %c0_27] : memref<1x128x128xbf16, #tpu.memory_space<vmem>>, vector<1x128x128xbf16>
    %57 = vector.shape_cast %56 : vector<1x128x128xbf16> to vector<128x128xbf16>
    %cst_28 = arith.constant dense<0.000000e+00> : vector<16x128xf32>
    %58 = tpu.matmul %55, %57, %cst_28 {dimension_numbers = #tpu.dot_dimension_numbers<[1], [0], [0], [1], [0, 0, 1, 1], [], []>} : vector<16x128xbf16>, vector<128x128xbf16>, vector<16x128xf32> -> vector<16x128xf32>
    %59 = vector.extract_strided_slice %1 {offsets = [3, 0], sizes = [1, 128], strides = [1, 1]} : vector<8x128xf32> to vector<1x128xf32>
    %60 = vector.shape_cast %59 : vector<1x128xf32> to vector<128xf32>
    %61 = vector.shape_cast %60 : vector<128xf32> to vector<1x128xf32>
    %62 = vector.broadcast %61 : vector<1x128xf32> to vector<16x128xf32>
    %63 = arith.addf %58, %62 : vector<16x128xf32>
    %cst_29 = arith.constant 5.000000e-01 : f32
    %64 = vector.broadcast %cst_29 : f32 to vector<16x128xf32>
    %65 = arith.mulf %64, %63 : vector<16x128xf32>
    %66 = math.tanh %65 : vector<16x128xf32>
    %cst_30 = arith.constant 1.000000e+00 : f32
    %67 = vector.broadcast %cst_30 : f32 to vector<16x128xf32>
    %68 = arith.addf %67, %66 : vector<16x128xf32>
    %cst_31 = arith.constant 5.000000e-01 : f32
    %69 = vector.broadcast %cst_31 : f32 to vector<16x128xf32>
    %70 = arith.mulf %69, %68 : vector<16x128xf32>
    %71 = arith.mulf %63, %70 : vector<16x128xf32>
    %72 = arith.truncf %71 : vector<16x128xf32> to vector<16x128xbf16>
    %c0_32 = arith.constant 0 : index
    %c0_33 = arith.constant 0 : index
    %c0_34 = arith.constant 0 : index
    %73 = vector.load %arg7[%c0_32, %c0_33, %c0_34] : memref<1x128x6xbf16, #tpu.memory_space<vmem>>, vector<1x128x6xbf16>
    %74 = vector.shape_cast %73 : vector<1x128x6xbf16> to vector<128x6xbf16>
    %cst_35 = arith.constant dense<0.000000e+00> : vector<16x6xf32>
    %75 = tpu.matmul %72, %74, %cst_35 {dimension_numbers = #tpu.dot_dimension_numbers<[1], [0], [0], [1], [0, 0, 1, 1], [], []>} : vector<16x128xbf16>, vector<128x6xbf16>, vector<16x6xf32> -> vector<16x6xf32>
    %76 = vector.extract_strided_slice %1 {offsets = [4, 0], sizes = [1, 6], strides = [1, 1]} : vector<8x128xf32> to vector<1x6xf32>
    %77 = vector.shape_cast %76 : vector<1x6xf32> to vector<6xf32>
    %78 = vector.shape_cast %77 : vector<6xf32> to vector<1x6xf32>
    %79 = vector.broadcast %78 : vector<1x6xf32> to vector<16x6xf32>
    %80 = arith.addf %75, %79 : vector<16x6xf32>
    %c0_36 = arith.constant 0 : index
    %c0_37 = arith.constant 0 : index
    %c0_38 = arith.constant 0 : index
    %81 = vector.load %arg9[%c0_36, %c0_37, %c0_38] : memref<1x16x6xf32, #tpu.memory_space<vmem>>, vector<1x16x6xf32>
    %82 = vector.shape_cast %81 : vector<1x16x6xf32> to vector<16x6xf32>
    %83 = vector.shape_cast %80 : vector<16x6xf32> to vector<1x16x6xf32>
    tpu.vector_store %arg9[%c0_36, %c0_37, %c0_38], %83 {strides = array<i32>} : memref<1x16x6xf32, #tpu.memory_space<vmem>>, vector<1x16x6xf32>,
    return
  }
  func.func @transform_0(%arg0: i32, %arg1: i32) -> (i32, i32, i32) {
    %c0_i32 = arith.constant 0 : i32
    %c0_i32_0 = arith.constant 0 : i32
    return %arg0, %arg1, %c0_i32 : i32, i32, i32
  }
  func.func @transform_1(%arg0: i32, %arg1: i32) -> (i32, i32, i32) {
    %c0_i32 = arith.constant 0 : i32
    %c0_i32_0 = arith.constant 0 : i32
    %c0_i32_1 = arith.constant 0 : i32
    return %arg0, %c0_i32, %c0_i32_0 : i32, i32, i32
  }
  func.func @transform_2(%arg0: i32, %arg1: i32) -> (i32, i32, i32) {
    %c0_i32 = arith.constant 0 : i32
    %c0_i32_0 = arith.constant 0 : i32
    %c0_i32_1 = arith.constant 0 : i32
    return %arg0, %c0_i32, %c0_i32_0 : i32, i32, i32
  }
  func.func @transform_3(%arg0: i32, %arg1: i32) -> (i32, i32, i32) {
    %c0_i32 = arith.constant 0 : i32
    %c0_i32_0 = arith.constant 0 : i32
    %c0_i32_1 = arith.constant 0 : i32
    return %arg0, %c0_i32, %c0_i32_0 : i32, i32, i32
  }
  func.func @transform_4(%arg0: i32, %arg1: i32) -> (i32, i32, i32) {
    %c0_i32 = arith.constant 0 : i32
    %c0_i32_0 = arith.constant 0 : i32
    %c0_i32_1 = arith.constant 0 : i32
    return %arg0, %c0_i32, %c0_i32_0 : i32, i32, i32
  }
  func.func @transform_5(%arg0: i32, %arg1: i32) -> (i32, i32, i32) {
    %c0_i32 = arith.constant 0 : i32
    %c0_i32_0 = arith.constant 0 : i32
    %c0_i32_1 = arith.constant 0 : i32
    return %arg0, %c0_i32, %c0_i32_0 : i32, i32, i32
  }
  func.func @transform_6(%arg0: i32, %arg1: i32) -> (i32, i32, i32) {
    %c0_i32 = arith.constant 0 : i32
    %c0_i32_0 = arith.constant 0 : i32
    %c0_i32_1 = arith.constant 0 : i32
    return %arg0, %c0_i32, %c0_i32_0 : i32, i32, i32
  }
  func.func @transform_7(%arg0: i32, %arg1: i32) -> (i32, i32, i32) {
    %c0_i32 = arith.constant 0 : i32
    %c0_i32_0 = arith.constant 0 : i32
    return %arg0, %arg1, %c0_i32 : i32, i32, i32
  }
}

</mosaic_0001>

<bundles_post_ra>
// kernel: ensemble_model_forward.1
= control target key start
LH: loop header
LB: loop body
LE: loop exit
PB: predicated region body
PF: predicated region fallthrough
CT: control target
= control target key end

     0   :  { %12 = vsyncpa [#allocation3], 0  ;;  %s1963_s0 = inlined_call_operand.vmem [shape: f32[4,16,8], index: 0, kind: input, shape index: {}]   ;;  %s1964_s1 = inlined_call_operand.vmem [shape: bf16[4,8,128], index: 1, kind: input, shape index: {}]   ;;  %s1965_s2 = inlined_call_operand.vmem [shape: bf16[4,128,128], index: 2, kind: input, shape index: {}]   ;;  %s1966_s3 = inlined_call_operand.hbm [shape: bf16[4,128,128], index: 3, kind: input, shape index: {}]   ;;  %s1967_s4 = inlined_call_operand.hbm [shape: bf16[4,128,128], index: 4, kind: input, shape index: {}]   ;;  %s1968_s5 = inlined_call_operand.vmem [shape: bf16[4,128,6], index: 5, kind: input, shape index: {}]   ;;  %s1969_s6 = inlined_call_operand.vmem [shape: f32[4,8,128], index: 6, kind: input, shape index: {}]   ;;  %s1970_s7 = inlined_call_operand.vmem [shape: f32[4,16,6], index: 7, kind: output, shape index: {}]  }
   0x1   :  { %14 = vsyncpa [#allocation3 + $0x1], 0 }
   0x2   :  { %15 = vsyncpa [#allocation5], 0 }
   0x3   :  { %17 = vsyncpa [#allocation5 + $0x1], 0  ;;  %s1657_s24 = smov 0   ;;  %s1659_s25 = smov 0  }
   0x4   :  { %s1661_s26 = smov 0   ;;  %s1663_s27 = smov 0  }
   0x5   :  { %s1665_s28 = smov 0   ;;  %s1667_s29 = smov 0  }
   0x6 LB: > { %s1195_s30 = sadd.s32 4294967295, %s1609_s29   ;;  %s35_s8 = sadd.s32 1, %s1605_s28  ;;  %s1609_s29 = sphi %s1667_s29, %s23_s29   ;;  %s1605_s28 = sphi %s1665_s28, %s1983_s28   ;;  %s1601_s27 = sphi %s1663_s27, %s1982_s27   ;;  %s1597_s26 = sphi %s1661_s26, %s1981_s26   ;;  %s1593_s25 = sphi %s1659_s25, %s1980_s25   ;;  %s1589_s24 = sphi %s1657_s24, %s1979_s24  }
   0x7   : > { %p37_p0 = scmp.ge.s32.totalorder %s35_s8, 4  ;;  %s122_s9 = sadd.s32 1, %s1597_s26 }
   0x8   : > { %p129_p1 = scmp.ne.s32.totalorder %s1597_s26, %s1593_s25  ;;  %p130_p2 = scmp.eq.s32.totalorder %s1609_s29, 0 }
   0x9   : > { %s1985_s8 = smov (%p37_p0, %s35_s8), 0  ;;  %p135_p4 = scmp.ne.s32.totalorder %s1593_s25, %s1589_s24 }
   0xa   : > { %p1693_p3 = por %p130_p2, %p129_p1  ;;  %s119_s11 = ssub.s32 %s1605_s28, %s1985_s8 }
   0xb   : > { %p136_p5 = scmp.eq.s32.totalorder %s1195_s30, 0  ;;  %p120_p6 = scmp.eq.s32.totalorder %s119_s11, 0 }
   0xc   : > { %p1394_p8 = scmp.lt.s32.totalorder %s1609_s29, 4  ;;  %s1709_s14 = sand.u32 1, %s1597_s26  }
   0xd   : > { %p1700_p7 = por %p136_p5, %p135_p4  ;;  %s1253_s15 = sshll.u32 %s1605_s28, 10 }
   0xe   : > { %s1706_s13 = scalar_select %p120_p6, %s1597_s26, %s122_s9  }
   0xf   : > { %s1974_s12 = scalar_select %p1700_p7, 1, 0 }
  0x10   : > { %s1199_s16 = sshll.u32 %s1709_s14, 6  ;;  %s1718_s19 = scalar_lea.hbm %s1966_s3, %s1253_s15 }
  0x11   : > { %s297_s20 = scalar_lea.vmem [#allocation2], %s1199_s16  ;;  %p1724_p9 = pnand %p1394_p8, %p1693_p3 }
  0x12   : > { %s304_s21 = sshll.u32 %s297_s20, 4  ;;  %s294_s23 = scalar_lea.sflag [#allocation3], %s1709_s14  ;;  %s1728_s21 = int_to_ptr.vmem [resolvable:$true] %s304_s21 }
  0x13   : > { %s1495_s24 = scalar_lea.hbm %s1718_s19, 1024  ;;  %p1497_p11 = pneg %p1724_p9 }
  0x14   : > { %p1496_p10 = scmp.ne.s32.totalorder %s1718_s19, %s1495_s24  ;;  %s1500_s10 = scalar_lea.hbm %s1966_s3, 4096 }
  0x15   : > { %p1501_p0 = scmp.lt.u32.totalorder %s1718_s19, %s1966_s3  ;;  %p1502_p1 = scmp.lt.u32.totalorder %s1500_s10, %s1495_s24 }
  0x16   : > { %p1498_p12 = pnand %p1497_p11, %p1496_p10  ;;  %p1504_p3 = scmp.lt.u32.totalorder %s1495_s24, %s1718_s19 }
  0x17   : > { %p1503_p2 = por %p1502_p1, %p1501_p0 }
  0x18   : > { %p1499_p13 = pneg %p1498_p12 }
  0x19   : > { %p1505_p4 = por %p1504_p3, %p1503_p2 }
  0x1b   : > { %p1506_p5 = pnand %p1505_p4, %p1499_p13 }
  0x1d   : > { %1509 = shalt.err (!%p1506_p5)
}
  0x1e   : > { %s1510_s18 = scalar_lea.vmem %s1728_s21, 1024  ;;  %s1611_s20 = smov [#allocation2]  }
  0x1f   : > { %p1511_p6 = scmp.ne.s32.totalorder %s1728_s21, %s1510_s18  ;;  %s1515_s30 = sshll.u32 %s1611_s20, 4  ;;  %s1516_s30 = int_to_ptr.vmem [resolvable:$false] %s1515_s30 }
  0x20   : > { %s1517_s9 = scalar_lea.vmem %s1516_s30, 2048  ;;  %p1518_p12 = scmp.lt.s32.totalorder %s1728_s21, %s1516_s30 }
  0x21   : > { %p1513_p8 = pnand %p1511_p6, %p1497_p11  ;;  %p1519_p0 = scmp.lt.s32.totalorder %s1517_s9, %s1510_s18 }
  0x23   : > { %p1514_p10 = pneg %p1513_p8  ;;  %p1520_p1 = por %p1519_p0, %p1518_p12 }
  0x25   : > { %p1521_p2 = pnand %p1520_p1, %p1514_p10 }
  0x27   : > { %1524 = shalt.err (!%p1521_p2)
}
  0x28   : > { %s1971_s24 = smov 64   ;;  %s1613_s10 = smov 4  }
  0x29   : > { %1390 = dma.hbm_to_vmem [thread:$0]  (!%p1724_p9), %s1718_s19, 1024, %s1728_s21, %s294_s23, %s1971_s24, %s1971_s24, %s1613_s10  }
  0x2a   : > { %p1205_p13 = scmp.ge.s32.totalorder %s1609_s29, 1  ;;  %p348_p3 = scmp.lt.s32.totalorder %s1609_s29, 5 }
  0x2b   : > { %s1772_s20 = scalar_lea.hbm %s1967_s4, %s1253_s15  ;;  %s318_s30 = scalar_lea.vmem [#allocation4], %s1199_s16 }
  0x2c   : > { %p1763_p4 = pnand %p1205_p13, %p348_p3  ;;  %s325_s9 = sshll.u32 %s318_s30, 4  ;;  %s1776_s9 = int_to_ptr.vmem [resolvable:$true] %s325_s9 }
  0x2d   : > { %s315_s19 = scalar_lea.sflag [#allocation5], %s1709_s14  ;;  %s1525_s21 = scalar_lea.hbm %s1772_s20, 1024 }
  0x2e   : > { %p1526_p5 = scmp.ne.s32.totalorder %s1772_s20, %s1525_s21  ;;  %s1530_s15 = scalar_lea.hbm %s1967_s4, 4096 }
  0x2f   : > { %p1531_p10 = scmp.lt.u32.totalorder %s1772_s20, %s1967_s4  ;;  %p1532_p12 = scmp.lt.u32.totalorder %s1530_s15, %s1525_s21 }
  0x30   : > { %p1528_p6 = pnand %p1526_p5, %p1497_p11  ;;  %p1534_p1 = scmp.lt.u32.totalorder %s1525_s21, %s1772_s20 }
  0x31   : > { %p1533_p0 = por %p1532_p12, %p1531_p10 }
  0x32   : > { %p1529_p8 = pneg %p1528_p6 }
  0x33   : > { %p1535_p2 = por %p1534_p1, %p1533_p0 }
  0x35   : > { %p1536_p13 = pnand %p1535_p2, %p1529_p8 }
  0x37   : > { %1539 = shalt.err (!%p1536_p13)
}
  0x38   : > { %s1540_s16 = scalar_lea.vmem %s1776_s9, 1024  ;;  %s1614_s30 = smov [#allocation4]  }
  0x39   : > { %p1541_p3 = scmp.ne.s32.totalorder %s1776_s9, %s1540_s16  ;;  %s1545_s23 = sshll.u32 %s1614_s30, 4  ;;  %s1546_s23 = int_to_ptr.vmem [resolvable:$false] %s1545_s23 }
  0x3a   : > { %s1547_s24 = scalar_lea.vmem %s1546_s23, 2048  ;;  %p1548_p7 = scmp.lt.s32.totalorder %s1776_s9, %s1546_s23 }
  0x3b   : > { %p1543_p5 = pnand %p1541_p3, %p1497_p11  ;;  %p1549_p10 = scmp.lt.s32.totalorder %s1547_s24, %s1540_s16 }
  0x3d   : > { %p1544_p6 = pneg %p1543_p5  ;;  %p1550_p12 = por %p1549_p10, %p1548_p7 }
  0x3f   : > { %p1551_p0 = pnand %p1550_p12, %p1544_p6 }
  0x41   : > { %1554 = shalt.err (!%p1551_p0)
}
  0x42   : > { %s1977_s21 = smov 64   ;;  %352 = sbr.rel (%p1763_p4) target bundleno = 1251 (0x4e3), region = 48 }
  0x43   : > { %1393 = dma.hbm_to_vmem [thread:$0]  (!%p1724_p9), %s1772_s20, 1024, %s1776_s9, %s315_s19, %s1977_s21, %s1977_s21, %s1613_s10  }
  0x44   : > { %s354_s17 = sand.u32 (!%p1763_p4), 1, %s1593_s25   ;;  %p1978_p7 = scmp.ne.s32.totalorder (!%p1763_p4), %s1974_s12, 0 }
  0x45   : > { %s1206_s15 = sshll.u32 (!%p1763_p4), %s354_s17, 6  ;;  %s355_s18 = scalar_lea.sflag (!%p1763_p4), [#allocation3], %s354_s17 }
  0x46   : > { %s1810_s16 = scalar_lea.vmem (!%p1763_p4), [#allocation2], %s1206_s15 }
  0x49   : > { %1580 = dma.done.wait (%p1978_p7), %s355_s18, 1024  }
  0x4a   : > { %1582 = vsyncadd (%p1978_p7), %s355_s18, 4294966272  ;;  %s364_s14 = scalar_lea.sflag [#allocation5], %s354_s17  ;;  %s1816_s22 = scalar_lea.vmem [#allocation4], %s1206_s15 }
  0x4b   : > { %1584 = dma.done.wait (%p1978_p7), %s364_s14, 1024  }
  0x4c   : > { %1586 = vsyncadd (%p1978_p7), %s364_s14, 4294966272  ;;  %p435_p9 = scmp.lt.s32.totalorder %s1601_s27, 3  ;;  %v1615_v0 = vmov 0.0   ;;  %vm1616_vm0 = vmmov 0   ;;  %vm486_vm1 = vcmask 1043456   ;;  %vm482_vm2 = vcmask 64512  }
  0x4d   : > { %1297 = vmatprep.subr.bf16.mxu0 %v1615_v0  ;;  %1299 = vmatprep.mubr.msk.bf16.mxu0 %vm1616_vm0, %v1615_v0  ;;  %v1455_v14 = vld [vmem:[%s1810_s16] sm:$0xff]   ;;  %v1456_v15 = vld [vmem:[%s1810_s16 + $0x8] sm:$0xff]   ;;  %v478_v16 = vlaneseq  ;;  %v1457_v38 = vld [vmem:[%s1810_s16 + $0x10] sm:$0xff]   ;;  %vm1011_vm3 = vcmask 48128  }
  0x4e   : > { %s1987_s27 = smov (!%p435_p9, %s1601_s27), 3  ;;  %1303 = vmatprep.subr.bf16.mxu1 %v1615_v0  ;;  %1319 = vmatprep.mubr.msk.bf16.mxu1 %vm1616_vm0, %v1615_v0  ;;  %v1458_v39 = vld [vmem:[%s1810_s16 + $0x18] sm:$0xff]   ;;  %v1459_v40 = vld [vmem:[%s1810_s16 + $0x20] sm:$0xff]   ;;  %v1460_v41 = vld [vmem:[%s1810_s16 + $0x28] sm:$0xff]  }
  0x4f   : > { %s1210_s12 = sshll.u32 %s1987_s27, 2  ;;  %s1256_s10 = sshll.u32 %s1987_s27, 6  ;;  %v1877_v17 = vshrl.u32 %v478_v16, 7  ;;  %v1461_v42 = vld [vmem:[%s1810_s16 + $0x30] sm:$0xff]   ;;  %v1462_v43 = vld [vmem:[%s1810_s16 + $0x38] sm:$0xff]   ;;  %v1463_v44 = vld [vmem:[%s1816_s22] sm:$0xff]  }
  0x50   : > { %s447_s9 = scalar_lea.vmem %s1964_s1, %s1210_s12  ;;  %s1840_s23 = scalar_lea.vmem %s1965_s2, %s1256_s10  ;;  %v1464_v45 = vld [vmem:[%s1816_s22 + $0x8] sm:$0xff]  }
  0x51   : > { %s1255_s24 = sshll.u32 %s1987_s27, 4  ;;  %v477_v1 = vld [vmem:[%s447_s9] sm:$0xf]  ;;  %v1448_v7 = vld [vmem:[%s1840_s23 + $0x8] sm:$0xff]   ;;  %s1858_s12 = scalar_lea.vmem %s1968_s5, %s1256_s10  ;;  %v1449_v8 = vld [vmem:[%s1840_s23 + $0x10] sm:$0xff]   ;;  %v480_v18 = vsub.s32 0, %v1877_v17 }
  0x52   : > { %s442_s15 = scalar_lea.vmem %s1963_s0, %s1255_s24  ;;  %v488_v2 = vsel %vm486_vm1, %v477_v1, 0  ;;  %v1447_v5 = vld [vmem:[%s1840_s23] sm:$0xff]   ;;  %v1450_v9 = vld [vmem:[%s1840_s23 + $0x18] sm:$0xff]   ;;  %v1452_v11 = vld [vmem:[%s1840_s23 + $0x28] sm:$0xff]   ;;  %s1215_s10 = sshll.u32 %s1987_s27, 3  ;;  %v560_v46 = vsub.s32 1, %v1877_v17 }
  0x53   : > { %v474_v3 = vld [vmem:[%s442_s15] sm:$0xff]  ;;  %v475_v4 = vld [vmem:[%s442_s15 + $0x8] sm:$0xff]  ;;  %1298 = vmatpush3.bf16.msra.mxu0 %v488_v2  ;;  %1304 = vmatpush3.bf16.msra.mxu1 %v1447_v5  ;;  %v1453_v12 = vld [vmem:[%s1840_s23 + $0x30] sm:$0xff]   ;;  %s461_s9 = scalar_lea.vmem %s1969_s6, %s1215_s10  ;;  %s470_s19 = scalar_lea.vmem %s1970_s7, %s1255_s24 }
  0x54   : > { %v476_v6 = vpack.c.bf16 %v475_v4, %v474_v3  ;;  %1323 = vmatprep.subr.bf16.mxu0 %v1615_v0  ;;  %1305 = vmatprep.subr.bf16.mxu1 %v1615_v0  ;;  %v1451_v10 = vld [vmem:[%s1840_s23 + $0x20] sm:$0xff]   ;;  %v1454_v13 = vld [vmem:[%s1840_s23 + $0x38] sm:$0xff]   ;;  %v1465_v2 = vld [vmem:[%s1816_s22 + $0x10] sm:$0xff]  }
  0x55   : > { %v1883_v19 = vld [vmem:[%s461_s9] sm:$0xff]  ;;  %v1466_v3 = vld [vmem:[%s1816_s22 + $0x18] sm:$0xff]   ;;  %v1468_v5 = vld [vmem:[%s1816_s22 + $0x28] sm:$0xff]  }
  0x56   : > { %1300 = vmatmul.mubr.msk.bf16.vlgmr.msra.gmra.mrb[0].mxu0 %vm482_vm2, %v476_v6  ;;  %v481_v20 = vrot.slane %v1883_v19, %v480_v18  ;;  %v561_v47 = vrot.slane %v1883_v19, %v560_v46  ;;  %v1467_v4 = vld [vmem:[%s1816_s22 + $0x20] sm:$0xff]   ;;  %v1469_v6 = vld [vmem:[%s1816_s22 + $0x30] sm:$0xff]  }
  0x57   : > { %1339 = vmatprep.mubr.msk.bf16.mxu0 %vm1616_vm0, %v1615_v0  ;;  %1306 = vmatpush3.bf16.msra.mxu1 %v1448_v7  ;;  %v1470_v7 = vld [vmem:[%s1816_s22 + $0x38] sm:$0xff]  }
  0x58   : > { %1307 = vmatprep.subr.bf16.mxu1 %v1615_v0  ;;  %1324 = vmatpush3.bf16.msra.mxu0 %v1455_v14 }
  0x59   : > { %1325 = vmatprep.subr.bf16.mxu0 %v1615_v0 }
  0x5b   : > { %1308 = vmatpush3.bf16.msra.mxu1 %v1449_v8  ;;  %v1471_v8 = vld [vmem:[%s1858_s12] sm:$0xff]  }
  0x5c   : > { %1309 = vmatprep.subr.bf16.mxu1 %v1615_v0  ;;  %1326 = vmatpush3.bf16.msra.mxu0 %v1456_v15 }
  0x5d   : > { %1327 = vmatprep.subr.bf16.mxu0 %v1615_v0 }
  0x5f   : > { %1310 = vmatpush3.bf16.msra.mxu1 %v1450_v9  ;;  %v1472_v9 = vld [vmem:[%s1858_s12 + $0x8] sm:$0xff]  }
  0x60   : > { %1311 = vmatprep.subr.bf16.mxu1 %v1615_v0  ;;  %1328 = vmatpush3.bf16.msra.mxu0 %v1457_v38 }
  0x61   : > { %1329 = vmatprep.subr.bf16.mxu0 %v1615_v0 }
  0x63   : > { %1312 = vmatpush3.bf16.msra.mxu1 %v1451_v10  ;;  %v680_v10 = vsub.s32 2, %v1877_v17 }
  0x64   : > { %1313 = vmatprep.subr.bf16.mxu1 %v1615_v0  ;;  %1330 = vmatpush3.bf16.msra.mxu0 %v1458_v39 }
  0x65   : > { %1331 = vmatprep.subr.bf16.mxu0 %v1615_v0 }
  0x67   : > { %1314 = vmatpush3.bf16.msra.mxu1 %v1452_v11  ;;  %v681_v11 = vrot.slane %v1883_v19, %v680_v10 }
  0x68   : > { %1315 = vmatprep.subr.bf16.mxu1 %v1615_v0  ;;  %1332 = vmatpush3.bf16.msra.mxu0 %v1459_v40 }
  0x69   : > { %1333 = vmatprep.subr.bf16.mxu0 %v1615_v0 }
  0x6b   : > { %1316 = vmatpush3.bf16.msra.mxu1 %v1453_v12 }
  0x6c   : > { %1317 = vmatprep.subr.bf16.mxu1 %v1615_v0  ;;  %1334 = vmatpush3.bf16.msra.mxu0 %v1460_v41 }
  0x6d   : > { %1335 = vmatprep.subr.bf16.mxu0 %v1615_v0 }
  0x6f   : > { %1318 = vmatpush3.bf16.msra.mxu1 %v1454_v13 }
  0x70   : > { %1343 = vmatprep.subr.bf16.mxu1 %v1615_v0  ;;  %1336 = vmatpush3.bf16.msra.mxu0 %v1461_v42 }
  0x71   : > { %1337 = vmatprep.subr.bf16.mxu0 %v1615_v0 }
  0x74   : > { %1338 = vmatpush3.bf16.msra.mxu0 %v1462_v43 }
  0x75   : > { %1363 = vmatprep.subr.bf16.mxu0 %v1615_v0 }
 0x129   : > { %v524_v21 = vpop.f32.mrb[0].mxu0 }
 0x12a   : > { %v525_v22 = vadd.f32 %v524_v21, %v481_v20  ;;  %v1301_v23 = vpop.f32.mrb[1].mxu0 }
 0x12b   : > { %v527_v24 = vpop.f32.mrb[2].mxu0 }
 0x12c   : > { %v531_v25 = vmul.f32 0.5, %v525_v22  ;;  %v528_v26 = vadd.f32 %v527_v24, %v481_v20  ;;  %v1302_v27 = vpop.f32.mrb[3].mxu0 }
 0x12e   : > { %1479 = vtanh.f32 %v531_v25  ;;  %v532_v28 = vmul.f32 0.5, %v528_v26 }
 0x130   : > { %1481 = vtanh.f32 %v532_v28 }
 0x138   : > { %v1480_v29 = vpop.eup %1479 }
 0x139   : > { %v535_v30 = vadd.f32 1.0, %v1480_v29 }
 0x13a   : > { %v1482_v31 = vpop.eup %1481 }
 0x13b   : > { %v537_v32 = vmul.f32 0.5, %v535_v30  ;;  %v536_v33 = vadd.f32 1.0, %v1482_v31  ;;  %v1473_v31 = vld [vmem:[%s1858_s12 + $0x10] sm:$0xff]  }
 0x13d   : > { %v538_v34 = vmul.f32 0.5, %v536_v33  ;;  %v539_v35 = vmul.f32 %v537_v32, %v525_v22  ;;  %v1474_v32 = vld [vmem:[%s1858_s12 + $0x18] sm:$0xff]   ;;  %v1475_v33 = vld [vmem:[%s1858_s12 + $0x20] sm:$0xff]  }
 0x13f   : > { %v540_v36 = vmul.f32 %v538_v34, %v528_v26  ;;  %v1476_v34 = vld [vmem:[%s1858_s12 + $0x28] sm:$0xff]  }
 0x141   : > { %v541_v37 = vpack.c.bf16 %v540_v36, %v539_v35  ;;  %v1477_v35 = vld [vmem:[%s1858_s12 + $0x30] sm:$0xff]   ;;  %v1478_v36 = vld [vmem:[%s1858_s12 + $0x38] sm:$0xff]  }
 0x143   : > { %1320 = vmatmul.mubr.bf16.vlgmr.msra.gmra.mrb[0].mxu1 %v541_v37  ;;  %v800_v37 = vsub.s32 3, %v1877_v17 }
 0x144   : > { %1359 = vmatprep.mubr.msk.bf16.mxu1 %vm1616_vm0, %v1615_v0  ;;  %1344 = vmatpush3.bf16.msra.mxu1 %v1463_v44 }
 0x145   : > { %1345 = vmatprep.subr.bf16.mxu1 %v1615_v0  ;;  %v801_v38 = vrot.slane %v1883_v19, %v800_v37 }
 0x148   : > { %1346 = vmatpush3.bf16.msra.mxu1 %v1464_v45 }
 0x149   : > { %1347 = vmatprep.subr.bf16.mxu1 %v1615_v0 }
 0x14c   : > { %1348 = vmatpush3.bf16.msra.mxu1 %v1465_v2 }
 0x14d   : > { %1349 = vmatprep.subr.bf16.mxu1 %v1615_v0 }
 0x150   : > { %1350 = vmatpush3.bf16.msra.mxu1 %v1466_v3 }
 0x151   : > { %1351 = vmatprep.subr.bf16.mxu1 %v1615_v0 }
 0x154   : > { %1352 = vmatpush3.bf16.msra.mxu1 %v1467_v4 }
 0x155   : > { %1353 = vmatprep.subr.bf16.mxu1 %v1615_v0 }
 0x158   : > { %1354 = vmatpush3.bf16.msra.mxu1 %v1468_v5 }
 0x159   : > { %1355 = vmatprep.subr.bf16.mxu1 %v1615_v0 }
 0x15c   : > { %1356 = vmatpush3.bf16.msra.mxu1 %v1469_v6 }
 0x15d   : > { %1357 = vmatprep.subr.bf16.mxu1 %v1615_v0 }
 0x160   : > { %1358 = vmatpush3.bf16.msra.mxu1 %v1470_v7 }
 0x216   : > { %v644_v48 = vpop.f32.mrb[0].mxu1 }
 0x217   : > { %v645_v49 = vadd.f32 %v644_v48, %v561_v47  ;;  %v1321_v50 = vpop.f32.mrb[1].mxu1 }
 0x218   : > { %v647_v51 = vpop.f32.mrb[2].mxu1 }
 0x219   : > { %v651_v52 = vmul.f32 0.5, %v645_v49  ;;  %v648_v53 = vadd.f32 %v647_v51, %v561_v47  ;;  %v1322_v54 = vpop.f32.mrb[3].mxu1 }
 0x21b   : > { %1483 = vtanh.f32 %v651_v52  ;;  %v652_v55 = vmul.f32 0.5, %v648_v53 }
 0x21d   : > { %1485 = vtanh.f32 %v652_v55  ;;  %v920_v55 = vsub.s32 4, %v1877_v17 }
 0x225   : > { %v1484_v56 = vpop.eup %1483 }
 0x226   : > { %v655_v57 = vadd.f32 1.0, %v1484_v56  ;;  %v921_v56 = vrot.slane %v1883_v19, %v920_v55 }
 0x227   : > { %v1486_v58 = vpop.eup %1485 }
 0x228   : > { %v657_v59 = vmul.f32 0.5, %v655_v57  ;;  %v656_v60 = vadd.f32 1.0, %v1486_v58 }
 0x22a   : > { %v658_v61 = vmul.f32 0.5, %v656_v60  ;;  %v659_v62 = vmul.f32 %v657_v59, %v645_v49 }
 0x22c   : > { %v660_v63 = vmul.f32 %v658_v61, %v648_v53 }
 0x22e   : > { %v661_v1 = vpack.c.bf16 %v660_v63, %v659_v62 }
 0x230   : > { %1340 = vmatmul.mubr.bf16.vlgmr.msra.gmra.mrb[4].mxu0 %v661_v1 }
 0x231   : > { %1379 = vmatprep.mubr.msk.bf16.mxu0 %vm1616_vm0, %v1615_v0  ;;  %1364 = vmatpush3.bf16.msra.mxu0 %v1471_v8 }
 0x232   : > { %1365 = vmatprep.subr.bf16.mxu0 %v1615_v0 }
 0x235   : > { %1366 = vmatpush3.bf16.msra.mxu0 %v1472_v9 }
 0x236   : > { %1367 = vmatprep.subr.bf16.mxu0 %v1615_v0 }
 0x239   : > { %1368 = vmatpush3.bf16.msra.mxu0 %v1473_v31 }
 0x23a   : > { %1369 = vmatprep.subr.bf16.mxu0 %v1615_v0 }
 0x23d   : > { %1370 = vmatpush3.bf16.msra.mxu0 %v1474_v32 }
 0x23e   : > { %1371 = vmatprep.subr.bf16.mxu0 %v1615_v0 }
 0x241   : > { %1372 = vmatpush3.bf16.msra.mxu0 %v1475_v33 }
 0x242   : > { %1373 = vmatprep.subr.bf16.mxu0 %v1615_v0 }
 0x245   : > { %1374 = vmatpush3.bf16.msra.mxu0 %v1476_v34 }
 0x246   : > { %1375 = vmatprep.subr.bf16.mxu0 %v1615_v0 }
 0x249   : > { %1376 = vmatpush3.bf16.msra.mxu0 %v1477_v35 }
 0x24a   : > { %1377 = vmatprep.subr.bf16.mxu0 %v1615_v0 }
 0x24d   : > { %1378 = vmatpush3.bf16.msra.mxu0 %v1478_v36 }
 0x303   : > { %v764_v12 = vpop.f32.mrb[4].mxu0 }
 0x304   : > { %v765_v13 = vadd.f32 %v764_v12, %v681_v11  ;;  %v1341_v14 = vpop.f32.mrb[5].mxu0 }
 0x305   : > { %v767_v15 = vpop.f32.mrb[6].mxu0 }
 0x306   : > { %v771_v16 = vmul.f32 0.5, %v765_v13  ;;  %v768_v18 = vadd.f32 %v767_v15, %v681_v11  ;;  %v1342_v20 = vpop.f32.mrb[7].mxu0 }
 0x308   : > { %1487 = vtanh.f32 %v771_v16  ;;  %v772_v21 = vmul.f32 0.5, %v768_v18 }
 0x30a   : > { %1489 = vtanh.f32 %v772_v21 }
 0x312   : > { %v1488_v22 = vpop.eup %1487 }
 0x313   : > { %v775_v23 = vadd.f32 1.0, %v1488_v22 }
 0x314   : > { %v1490_v24 = vpop.eup %1489 }
 0x315   : > { %v777_v25 = vmul.f32 0.5, %v775_v23  ;;  %v776_v26 = vadd.f32 1.0, %v1490_v24 }
 0x317   : > { %v778_v27 = vmul.f32 0.5, %v776_v26  ;;  %v779_v28 = vmul.f32 %v777_v25, %v765_v13 }
 0x319   : > { %v780_v29 = vmul.f32 %v778_v27, %v768_v18 }
 0x31b   : > { %v781_v30 = vpack.c.bf16 %v780_v29, %v779_v28 }
 0x31d   : > { %1360 = vmatmul.mubr.bf16.vlgmr.msra.gmra.mrb[4].mxu1 %v781_v30 }
 0x3f0   : > { %v884_v39 = vpop.f32.mrb[4].mxu1 }
 0x3f1   : > { %v885_v40 = vadd.f32 %v884_v39, %v801_v38  ;;  %v1361_v41 = vpop.f32.mrb[5].mxu1 }
 0x3f2   : > { %v887_v42 = vpop.f32.mrb[6].mxu1 }
 0x3f3   : > { %v891_v43 = vmul.f32 0.5, %v885_v40  ;;  %v888_v44 = vadd.f32 %v887_v42, %v801_v38  ;;  %v1362_v45 = vpop.f32.mrb[7].mxu1 }
 0x3f5   : > { %1491 = vtanh.f32 %v891_v43  ;;  %v892_v46 = vmul.f32 0.5, %v888_v44 }
 0x3f7   : > { %1493 = vtanh.f32 %v892_v46 }
 0x3ff   : > { %v1492_v47 = vpop.eup %1491 }
 0x400   : > { %v895_v48 = vadd.f32 1.0, %v1492_v47 }
 0x401   : > { %v1494_v0 = vpop.eup %1493 }
 0x402   : > { %v897_v49 = vmul.f32 0.5, %v895_v48  ;;  %v896_v50 = vadd.f32 1.0, %v1494_v0 }
 0x404   : > { %v898_v51 = vmul.f32 0.5, %v896_v50  ;;  %v899_v52 = vmul.f32 %v897_v49, %v885_v40 }
 0x406   : > { %v900_v53 = vmul.f32 %v898_v51, %v888_v44 }
 0x408   : > { %v901_v54 = vpack.c.bf16 %v900_v53, %v899_v52 }
 0x40a   : > { %1380 = vmatmul.mubr.bf16.vlgmr.msra.gmra.mrb[8].mxu0 %v901_v54 }
 0x4dd   : > { %v1004_v57 = vpop.f32.mrb[8].mxu0 }
 0x4de   : > { %v1005_v58 = vadd.f32 %v1004_v57, %v921_v56  ;;  %v1381_v59 = vpop.f32.mrb[9].mxu0 }
 0x4df   : > { %v1007_v60 = vpop.f32.mrb[10].mxu0 }
 0x4e0   : > { %1012 = vst.msk [vmem:[%s470_s19] sm:$0xff] %vm1011_vm3, %v1005_v58  ;;  %v1008_v61 = vadd.f32 %v1007_v60, %v921_v56  ;;  %v1382_v62 = vpop.f32.mrb[11].mxu0 }
 0x4e2   : > { %1013 = vst.msk [vmem:[%s470_s19 + $0x8] sm:$0xff] %vm1011_vm3, %v1008_v61 }
 0x4e3 PF: > { %s23_s29 = sadd.s32 1, %s1609_s29   ;;  %s1979_s24 = smov %s1593_s25 }
 0x4e4   : > { %p20_p11 = scmp.ge.s32.totalorder %s23_s29, 6   ;;  %s1980_s25 = smov %s1597_s26 }
 0x4e5   : > { %s1981_s26 = smov %s1706_s13  ;;  %s1982_s27 = smov %s1605_s28 }
 0x4e6   : > { %s1983_s28 = smov %s1985_s8  ;;  %22 = sbr.rel (!%p20_p11) target bundleno = 6 (0x6), region = 116 }
 0x4ed   :  { %1044 = vsyncpa [#allocation3], 1 }
 0x4ee   :  { %1046 = vsyncpa [#allocation3 + $0x1], 1 }
 0x4ef   :  { %1047 = vsyncpa [#allocation5], 1 }
 0x4f0   :  { %1049 = vsyncpa [#allocation5 + $0x1], 1 }

</bundles_post_ra>
